<compile_context>
chip_gen: v6e
topology: v6e:2x2x1
jax: 0.10.0
libtpu: 0.0.40
codegen_flags: <defaults>
</compile_context>

<pallas_src>
import functools

import jax
import jax.numpy as jnp
from jax.experimental import pallas as pl
from jax.experimental.pallas import tpu as pltpu

_SQRT_2_OVER_PI = 0.7978845608028654


def _gelu_tanh_f32(h):
    # TODO(synk): PyTorch nn.GELU() default is the exact erf form; the tanh
    #             approximation used here deviates by ~1e-3 max abs.
    return 0.5 * h * (1.0 + jnp.tanh(_SQRT_2_OVER_PI * (h + 0.044715 * h * h * h)))


def _mlp_resident_kernel(x_ref, w1_ref, b1_ref, w2_ref, b2_ref, o_ref):
    """One (TM, C_out) output tile; full W1/W2 stay resident in VMEM.

      x_ref : (TM, C_in)  bf16 row tile
      w1_ref: (C_in, H)   bf16 (constant index_map -> fetched once)
      b1_ref: (1, H)      f32
      w2_ref: (H, C_out)  bf16 (constant index_map -> fetched once)
      b2_ref: (1, C_out)  f32
      o_ref : (TM, C_out)
    """
    h = jnp.dot(x_ref[...], w1_ref[...],
                preferred_element_type=jnp.float32) + b1_ref[...]
    h = _gelu_tanh_f32(h)
    # Dropout(p=0.0) is the identity -> nothing to do.
    out = jnp.dot(h.astype(w2_ref.dtype), w2_ref[...],
                  preferred_element_type=jnp.float32) + b2_ref[...]
    o_ref[...] = out.astype(o_ref.dtype)


def _mlp_stream_kernel(x_ref, w1_ref, b1_ref, w2_ref, b2_ref, o_ref, *scratch):
    """One (TM, C_out) output tile accumulated over the hidden (H) grid axis.

    grid = (M_tiles, H_tiles); H is the reduction axis.  When the output dtype
    is f32 no scratch is passed and we accumulate directly into o_ref (its
    block index is constant along k, so it stays VMEM-resident).
    """
    acc_ref = scratch[0] if scratch else o_ref
    k = pl.program_id(1)

    @pl.when(k == 0)
    def _init():
        # Fold the fc2 bias into the accumulator init (one broadcast per output
        # tile instead of one add per hidden chunk).
        acc_ref[...] = jnp.broadcast_to(
            b2_ref[...].astype(jnp.float32), acc_ref.shape)

    h = jnp.dot(x_ref[...], w1_ref[...],
                preferred_element_type=jnp.float32) + b1_ref[...]
    h = _gelu_tanh_f32(h)
    # Dropout(p=0.0) is the identity -> nothing to do.
    acc_ref[...] += jnp.dot(h.astype(w2_ref.dtype), w2_ref[...],
                            preferred_element_type=jnp.float32)

    if scratch:
        @pl.when(k == pl.num_programs(1) - 1)
        def _writeback():
            o_ref[...] = acc_ref[...].astype(o_ref.dtype)


def _round_up(a, b):
    return ((a + b - 1) // b) * b


def _vmem_capacity_bytes():
    try:
        return int(pltpu.get_tpu_info().vmem_capacity_bytes)
    except Exception:
        return 64 * 1024 * 1024   # conservative default: v7x per-TensorCore VMEM


def _pick_row_tile(M, tile_m):
    tm = max(8, min(tile_m, _round_up(M, 8)))
    # Keep >=2 row tiles whenever M allows it: on v7x the "parallel" M axis is
    # sharded across 2 TensorCores, and a single tile would idle one of them.
    if M > 8:
        tm = min(tm, max(8, _round_up(pl.cdiv(M, 2), 8)))
    return tm


def _pick_hidden_tile(H, tile_h):
    """Largest multiple of 128 that divides H and is <= tile_h.

    Returns (th, pad_h); pad_h > 0 only when H is not a multiple of 128, in
    which case the caller zero-pads the weights along H once at trace time.
    """
    tile_h = max(128, (tile_h // 128) * 128)
    if H % 128 == 0:
        for cand in range(min(tile_h, H), 0, -128):
            if H % cand == 0:
                return cand, 0
    Hp = _round_up(H, 128)
    for cand in range(min(tile_h, Hp), 0, -128):
        if Hp % cand == 0:
            return cand, Hp - H
    return Hp, Hp - H


def _resident_footprint(tm, C_in, H, C_out, wb, ob):
    return (2 * tm * C_in * wb          # x tile (double-buffered)
            + 2 * C_in * H * wb         # W1 (budget 2x; resident in practice)
            + 2 * H * 4                 # b1
            + 2 * H * C_out * wb        # W2
            + 2 * C_out * 4             # b2
            + 2 * tm * C_out * ob       # output tile
            + tm * H * 4                # fc1/gelu intermediate (f32)
            + tm * C_out * 4)           # fc2 result before cast


def _stream_footprint(tm, th, C_in, C_out, wb, ob, use_scratch):
    return (2 * tm * C_in * wb
            + 2 * C_in * th * wb
            + 2 * th * 4
            + 2 * th * C_out * wb
            + 2 * C_out * 4
            + 2 * tm * C_out * ob
            + (tm * C_out * 4 if use_scratch else 0)
            + tm * th * 4
            + tm * C_out * 4)


@functools.partial(
    jax.jit, static_argnames=("tile_m", "tile_h", "matmul_dtype", "force_stream"))
def mlp_pallas(x, w1, b1, w2, b2, *, tile_m=512, tile_h=512,
               matmul_dtype=jnp.bfloat16, force_stream=False):
    """Fused MLP: fc2(gelu(fc1(x))); Dropout(p=0.0) is the identity.

    x: (B, N, C_in); w1: (C_in, H); b1: (H,); w2: (H, C_out); b2: (C_out,).
    Weights are in (in, out) layout (transposed vs torch's (out, in)).
    """
    B, N, C_in = x.shape
    H = w1.shape[1]
    C_out = w2.shape[1]
    M = B * N

    out_dtype = x.dtype
    wb = jnp.dtype(matmul_dtype).itemsize
    ob = jnp.dtype(out_dtype).itemsize

    # Flatten tokens and pre-cast everything feeding the MXU once, outside the
    # kernel (no per-step recast; half the x DMA bytes).  Biases stay f32.
    x2d = x.reshape(M, C_in).astype(matmul_dtype)
    w1c = w1.astype(matmul_dtype)
    w2c = w2.astype(matmul_dtype)
    b1_2d = b1.reshape(1, H).astype(jnp.float32)
    b2_2d = b2.reshape(1, C_out).astype(jnp.float32)

    tm = _pick_row_tile(M, tile_m)
    n_row_tiles = pl.cdiv(M, tm)

    cap = _vmem_capacity_bytes()
    budget = int(cap * 0.70)

    resident = (not force_stream) and (
        _resident_footprint(tm, C_in, H, C_out, wb, ob) <= budget)

    if resident:
        footprint = _resident_footprint(tm, C_in, H, C_out, wb, ob)
        grid = (n_row_tiles,)
        in_specs = [
            pl.BlockSpec((tm, C_in), lambda i: (i, 0)),     # x row tile
            pl.BlockSpec((C_in, H), lambda i: (0, 0)),      # W1 (resident)
            pl.BlockSpec((1, H), lambda i: (0, 0)),         # b1 (resident)
            pl.BlockSpec((H, C_out), lambda i: (0, 0)),     # W2 (resident)
            pl.BlockSpec((1, C_out), lambda i: (0, 0)),     # b2 (resident)
        ]
        out_specs = pl.BlockSpec((tm, C_out), lambda i: (i, 0))
        scratch_shapes = ()
        kernel = _mlp_resident_kernel
        dim_sem = ("parallel",)
        weight_reads = 1
        hidden_cols = H
    else:
        th, pad_h = _pick_hidden_tile(H, tile_h)
        if pad_h:
            # Zero-pad the hidden dim so th | H_padded. Zero W2 rows guarantee
            # the padded hidden units contribute nothing to the output.
            w1c = jnp.pad(w1c, ((0, 0), (0, pad_h)))
            b1_2d = jnp.pad(b1_2d, ((0, 0), (0, pad_h)))
            w2c = jnp.pad(w2c, ((0, pad_h), (0, 0)))
        hidden_cols = H + pad_h

        use_scratch = jnp.dtype(out_dtype) != jnp.dtype(jnp.float32)
        # Shrink the row tile until the per-step footprint fits the budget.
        while (_stream_footprint(tm, th, C_in, C_out, wb, ob, use_scratch) > budget
               and tm > 8):
            tm = max(8, _round_up(tm // 2, 8))
        n_row_tiles = pl.cdiv(M, tm)
        footprint = _stream_footprint(tm, th, C_in, C_out, wb, ob, use_scratch)

        grid = (n_row_tiles, hidden_cols // th)
        in_specs = [
            pl.BlockSpec((tm, C_in), lambda i, k: (i, 0)),    # x rows (const over k)
            pl.BlockSpec((C_in, th), lambda i, k: (0, k)),    # W1 hidden slice
            pl.BlockSpec((1, th), lambda i, k: (0, k)),       # b1 hidden slice
            pl.BlockSpec((th, C_out), lambda i, k: (k, 0)),   # W2 hidden slice
            pl.BlockSpec((1, C_out), lambda i, k: (0, 0)),    # b2 (resident)
        ]
        out_specs = pl.BlockSpec((tm, C_out), lambda i, k: (i, 0))
        scratch_shapes = ((pltpu.VMEM((tm, C_out), jnp.float32),)
                          if use_scratch else ())
        kernel = _mlp_stream_kernel
        dim_sem = ("parallel", "arbitrary")
        weight_reads = n_row_tiles

    # Scoped-VMEM limit sized from the actual footprint (default 16/32 MiB is
    # far below physical and would reject the larger tiles / resident weights).
    vmem_limit = int(min(cap - (2 << 20), max(footprint * 5 // 4, 32 << 20)))

    flops = 2 * M * (C_in * H + H * C_out)
    bytes_accessed = (x2d.size * wb
                      + weight_reads * (w1c.size * wb + w2c.size * wb
                                        + b1_2d.size * 4 + b2_2d.size * 4)
                      + M * C_out * ob)

    out = pl.pallas_call(
        kernel,
        out_shape=jax.ShapeDtypeStruct((M, C_out), out_dtype),
        grid_spec=pltpu.PrefetchScalarGridSpec(
            num_scalar_prefetch=0,
            grid=grid,
            in_specs=in_specs,
            out_specs=out_specs,
            scratch_shapes=scratch_shapes,
        ),
        compiler_params=pltpu.CompilerParams(
            dimension_semantics=dim_sem,
            vmem_limit_bytes=vmem_limit),
        cost_estimate=pl.CostEstimate(
            flops=flops,
            transcendentals=M * hidden_cols,       # one tanh per hidden activation
            bytes_accessed=bytes_accessed),
    )(x2d, w1c, b1_2d, w2c, b2_2d)

    return out.reshape(B, N, C_out)


def _reference(x, w1, b1, w2, b2):
    h = x @ w1 + b1
    h = 0.5 * h * (1.0 + jnp.tanh(_SQRT_2_OVER_PI * (h + 0.044715 * h ** 3)))
    return h @ w2 + b2


if __name__ == "__main__":
    # --- Test 1: small MixSynthFormer-style shapes (resident-weight path) -----
    B, N, C_in, H, C_out = 2, 8, 16, 32, 16
    key = jax.random.PRNGKey(0)
    kx, kw1, kb1, kw2, kb2 = jax.random.split(key, 5)

    x = jax.random.normal(kx, (B, N, C_in), dtype=jnp.float32)
    w1 = jax.random.normal(kw1, (C_in, H), dtype=jnp.float32) * 0.02
    b1 = jax.random.normal(kb1, (H,), dtype=jnp.float32) * 0.02
    w2 = jax.random.normal(kw2, (H, C_out), dtype=jnp.float32) * 0.02
    b2 = jax.random.normal(kb2, (C_out,), dtype=jnp.float32) * 0.02

    out = jax.block_until_ready(mlp_pallas(x, w1, b1, w2, b2))
    ref = _reference(x, w1, b1, w2, b2)
    assert out.shape == (B, N, C_out)
    # bf16 MXU operands with f32 accumulation vs a pure-f32 reference.
    assert jnp.allclose(out, ref, atol=2e-3, rtol=2e-2), "resident path mismatch"

    # --- Test 2: streaming H-reduction path, f32 output accumulated in place --
    B2, N2, C2, H2, O2 = 2, 64, 32, 256, 32
    k2 = jax.random.split(jax.random.PRNGKey(1), 5)
    x2 = jax.random.normal(k2[0], (B2, N2, C2), dtype=jnp.float32)
    w1b = jax.random.normal(k2[1], (C2, H2), dtype=jnp.float32) * 0.02
    b1b = jax.random.normal(k2[2], (H2,), dtype=jnp.float32) * 0.02
    w2b = jax.random.normal(k2[3], (H2, O2), dtype=jnp.float32) * 0.02
    b2b = jax.random.normal(k2[4], (O2,), dtype=jnp.float32) * 0.02

    out2 = jax.block_until_ready(
        mlp_pallas(x2, w1b, b1b, w2b, b2b, tile_m=64, tile_h=128,
                   force_stream=True))
    ref2 = _reference(x2, w1b, b1b, w2b, b2b)
    assert jnp.allclose(out2, ref2, atol=2e-3, rtol=2e-2), "streaming path mismatch"

    # --- Test 3: streaming path with a non-f32 output (f32 scratch branch) ----
    out3 = jax.block_until_ready(
        mlp_pallas(x2.astype(jnp.bfloat16), w1b, b1b, w2b, b2b,
                   tile_m=64, tile_h=128, force_stream=True))
    assert jnp.allclose(out3.astype(jnp.float32), ref2, atol=3e-2, rtol=5e-2), \
        "streaming bf16-output path mismatch"

    print("KERNEL_OK")
</pallas_src>

<mosaic_0001>
module attributes {stable_mosaic.version = 11 : i64} {
  func.func @_mlp_resident_kernel(%arg0: i32, %arg1: memref<8x16xbf16, #tpu.memory_space<vmem>>, %arg2: memref<16x32xbf16, #tpu.memory_space<vmem>>, %arg3: memref<1x32xf32, #tpu.memory_space<vmem>>, %arg4: memref<32x16xbf16, #tpu.memory_space<vmem>>, %arg5: memref<1x16xf32, #tpu.memory_space<vmem>>, %arg6: memref<8x16xf32, #tpu.memory_space<vmem>>) attributes {dimension_semantics = [#tpu.dimension_semantics<parallel>], iteration_bounds = array<i64: 2>, scalar_prefetch = 0 : i64, scratch_operands = 0 : i64, tpu.core_type = #tpu.core_type<tc>, window_params = [{transform_indices = @transform_0, window_bounds = array<i64: 8, 16>}, {pipeline_mode = #tpu.pipeline_mode<synchronous>, transform_indices = @transform_1, window_bounds = array<i64: 16, 32>}, {pipeline_mode = #tpu.pipeline_mode<synchronous>, transform_indices = @transform_2, window_bounds = array<i64: 1, 32>}, {pipeline_mode = #tpu.pipeline_mode<synchronous>, transform_indices = @transform_3, window_bounds = array<i64: 32, 16>}, {pipeline_mode = #tpu.pipeline_mode<synchronous>, transform_indices = @transform_4, window_bounds = array<i64: 1, 16>}, {transform_indices = @transform_5, window_bounds = array<i64: 8, 16>}]} {
    %c0 = arith.constant 0 : index
    %c0_0 = arith.constant 0 : index
    %0 = vector.load %arg1[%c0, %c0_0] : memref<8x16xbf16, #tpu.memory_space<vmem>>, vector<8x16xbf16>
    %c0_1 = arith.constant 0 : index
    %c0_2 = arith.constant 0 : index
    %1 = vector.load %arg2[%c0_1, %c0_2] : memref<16x32xbf16, #tpu.memory_space<vmem>>, vector<16x32xbf16>
    %cst = arith.constant dense<0.000000e+00> : vector<8x32xf32>
    %2 = tpu.matmul %0, %1, %cst {dimension_numbers = #tpu.dot_dimension_numbers<[1], [0], [0], [1], [0, 0, 1, 1], [], []>} : vector<8x16xbf16>, vector<16x32xbf16>, vector<8x32xf32> -> vector<8x32xf32>
    %c0_3 = arith.constant 0 : index
    %c0_4 = arith.constant 0 : index
    %3 = vector.load %arg3[%c0_3, %c0_4] : memref<1x32xf32, #tpu.memory_space<vmem>>, vector<1x32xf32>
    %4 = vector.broadcast %3 : vector<1x32xf32> to vector<8x32xf32>
    %5 = arith.addf %2, %4 : vector<8x32xf32>
    %cst_5 = arith.constant 5.000000e-01 : f32
    %6 = vector.broadcast %cst_5 : f32 to vector<8x32xf32>
    %7 = arith.mulf %6, %5 : vector<8x32xf32>
    %cst_6 = arith.constant 4.471500e-02 : f32
    %8 = vector.broadcast %cst_6 : f32 to vector<8x32xf32>
    %9 = arith.mulf %8, %5 : vector<8x32xf32>
    %10 = arith.mulf %9, %5 : vector<8x32xf32>
    %11 = arith.mulf %10, %5 : vector<8x32xf32>
    %12 = arith.addf %5, %11 : vector<8x32xf32>
    %cst_7 = arith.constant 0.797884583 : f32
    %13 = vector.broadcast %cst_7 : f32 to vector<8x32xf32>
    %14 = arith.mulf %13, %12 : vector<8x32xf32>
    %15 = math.tanh %14 : vector<8x32xf32>
    %cst_8 = arith.constant 1.000000e+00 : f32
    %16 = vector.broadcast %cst_8 : f32 to vector<8x32xf32>
    %17 = arith.addf %16, %15 : vector<8x32xf32>
    %18 = arith.mulf %7, %17 : vector<8x32xf32>
    %19 = arith.truncf %18 : vector<8x32xf32> to vector<8x32xbf16>
    %c0_9 = arith.constant 0 : index
    %c0_10 = arith.constant 0 : index
    %20 = vector.load %arg4[%c0_9, %c0_10] : memref<32x16xbf16, #tpu.memory_space<vmem>>, vector<32x16xbf16>
    %cst_11 = arith.constant dense<0.000000e+00> : vector<8x16xf32>
    %21 = tpu.matmul %19, %20, %cst_11 {dimension_numbers = #tpu.dot_dimension_numbers<[1], [0], [0], [1], [0, 0, 1, 1], [], []>} : vector<8x32xbf16>, vector<32x16xbf16>, vector<8x16xf32> -> vector<8x16xf32>
    %c0_12 = arith.constant 0 : index
    %c0_13 = arith.constant 0 : index
    %22 = vector.load %arg5[%c0_12, %c0_13] : memref<1x16xf32, #tpu.memory_space<vmem>>, vector<1x16xf32>
    %23 = vector.broadcast %22 : vector<1x16xf32> to vector<8x16xf32>
    %24 = arith.addf %21, %23 : vector<8x16xf32>
    %c0_14 = arith.constant 0 : index
    %c0_15 = arith.constant 0 : index
    %25 = vector.load %arg6[%c0_14, %c0_15] : memref<8x16xf32, #tpu.memory_space<vmem>>, vector<8x16xf32>
    tpu.vector_store %arg6[%c0_14, %c0_15], %24 {strides = array<i32>} : memref<8x16xf32, #tpu.memory_space<vmem>>, vector<8x16xf32>,
    return
  }
  func.func @transform_0(%arg0: i32) -> (i32, i32) {
    %c0_i32 = arith.constant 0 : i32
    %c0_i32_0 = arith.constant 0 : i32
    return %arg0, %c0_i32 : i32, i32
  }
  func.func @transform_1(%arg0: i32) -> (i32, i32) {
    %c0_i32 = arith.constant 0 : i32
    %c0_i32_0 = arith.constant 0 : i32
    %c0_i32_1 = arith.constant 0 : i32
    return %c0_i32, %c0_i32_0 : i32, i32
  }
  func.func @transform_2(%arg0: i32) -> (i32, i32) {
    %c0_i32 = arith.constant 0 : i32
    %c0_i32_0 = arith.constant 0 : i32
    %c0_i32_1 = arith.constant 0 : i32
    return %c0_i32, %c0_i32_0 : i32, i32
  }
  func.func @transform_3(%arg0: i32) -> (i32, i32) {
    %c0_i32 = arith.constant 0 : i32
    %c0_i32_0 = arith.constant 0 : i32
    %c0_i32_1 = arith.constant 0 : i32
    return %c0_i32, %c0_i32_0 : i32, i32
  }
  func.func @transform_4(%arg0: i32) -> (i32, i32) {
    %c0_i32 = arith.constant 0 : i32
    %c0_i32_0 = arith.constant 0 : i32
    %c0_i32_1 = arith.constant 0 : i32
    return %c0_i32, %c0_i32_0 : i32, i32
  }
  func.func @transform_5(%arg0: i32) -> (i32, i32) {
    %c0_i32 = arith.constant 0 : i32
    %c0_i32_0 = arith.constant 0 : i32
    return %arg0, %c0_i32 : i32, i32
  }
}

</mosaic_0001>

<bundles_post_ra>
// kernel: mlp_pallas.1
= control target key start
LH: loop header
LB: loop body
LE: loop exit
PB: predicated region body
PF: predicated region fallthrough
CT: control target
= control target key end

     0   :  { %10 = vsyncpa [#allocation3], 0  ;;  %s725_s0 = inlined_call_operand.vmem [shape: bf16[16,16], index: 0, kind: input, shape index: {}]   ;;  %s726_s1 = inlined_call_operand.vmem [shape: bf16[16,32], index: 1, kind: input, shape index: {}]   ;;  %s727_s2 = inlined_call_operand.vmem [shape: f32[1,32], index: 2, kind: input, shape index: {}]   ;;  %s728_s3 = inlined_call_operand.vmem [shape: bf16[32,16], index: 3, kind: input, shape index: {}]   ;;  %s729_s4 = inlined_call_operand.vmem [shape: f32[1,16], index: 4, kind: input, shape index: {}]   ;;  %s730_s5 = inlined_call_operand.hbm [shape: f32[16,16], index: 5, kind: output, shape index: {}]  }
   0x1   :  { %12 = vsyncpa [#allocation3 + $0x1], 0  ;;  %s609_s18 = smov 0   ;;  %s611_s19 = smov 0  }
   0x2   :  { %s613_s20 = smov 0   ;;  %s615_s21 = smov 0  }
   0x3 LB: > { %s630_s22 = sadd.s32 4294967295, %s574_s21   ;;  %s432_s23 = sadd.s32 4294967294, %s574_s21   ;;  %s574_s21 = sphi %s615_s21, %s736_s21   ;;  %s570_s20 = sphi %s613_s20, %s735_s20   ;;  %s566_s19 = sphi %s611_s19, %s734_s19   ;;  %s562_s18 = sphi %s609_s18, %s733_s18  }
   0x4   : > { %s634_s24 = sadd.s32 1, %s574_s21   ;;  %s135_s25 = sadd.s32 1, %s570_s20 }
   0x5   : > { %s132_s26 = ssub.s32 %s574_s21, %s634_s24  ;;  %p145_p0 = scmp.ne.s32.totalorder %s570_s20, %s566_s19 }
   0x6   : > { %p133_p1 = scmp.eq.s32.totalorder %s132_s26, 0  ;;  %p146_p2 = scmp.eq.s32.totalorder %s630_s22, 1 }
   0x7   : > { %p151_p3 = scmp.ne.s32.totalorder %s566_s19, %s562_s18  ;;  %p152_p4 = scmp.eq.s32.totalorder %s432_s23, 1 }
   0x8   : > { %s645_s27 = scalar_select %p133_p1, %s570_s20, %s135_s25  }
   0x9   : > { %p647_p5 = por %p146_p2, %p145_p0  ;;  %p651_p6 = por %p152_p4, %p151_p3 }
   0xa   : > { %p435_p7 = scmp.ge.s32.totalorder %s574_s21, 1  ;;  %p189_p8 = scmp.lt.s32.totalorder %s574_s21, 3 }
   0xc   : > { %p190_p9 = pnand %p435_p7, %p189_p8 }
   0xd   : > { %p216_p10 = scmp.lt.s32.totalorder (!%p190_p9), %s630_s22, 1  ;;  %s213_s23 = sand.u32 (!%p190_p9), 1, %s566_s19  }
   0xe   : > { %193 = sbr.rel (%p190_p9) target bundleno = 458 (0x1ca), region = 40  ;;  %s436_s25 = sshll.u32 (!%p190_p9), %s213_s23, 3 }
   0xf   : > { %s446_s6 = sshll.u32 (!%p190_p9), %s630_s22, 7  ;;  %s360_s12 = scalar_lea.sflag (!%p190_p9), [#allocation3], %s213_s23 }
  0x10   : > { %s578_s13 = smov (!%p190_p9), [#allocation2]  }
  0x11   : > { %s518_s14 = sshll.u32 (!%p190_p9), %s578_s13, 4  ;;  %s519_s14 = int_to_ptr.vmem [resolvable:$false] %s518_s14 }
  0x12   : > { %s520_s15 = scalar_lea.vmem (!%p190_p9), %s519_s14, 256 }
  0x13   : > { %v509_v0 = vld [vmem:[%s726_s1] sm:$0xff]   ;;  %v576_v1 = vmov 0.0   ;;  %vm577_vm0 = vmmov 0   ;;  %s217_s7 = scalar_select %p216_p10, %s630_s22, 1  ;;  %vm237_vm1 = vcmask 130048   ;;  %v510_v3 = vld [vmem:[%s728_s3 + $0x8] sm:$0xff]  }
  0x14   : > { %454 = vmatprep.subr.bf16.mxu0 %v576_v1  ;;  %460 = vmatprep.subr.bf16.mxu1 %v576_v1  ;;  %v511_v4 = vld [vmem:[%s728_s3] sm:$0xff]   ;;  %vm314_vm2 = vcmask 261120  }
  0x15   : > { %455 = vmatpush3.bf16.msra.mxu0 %v509_v0  ;;  %456 = vmatprep.mubr.msk.bf16.mxu0 %vm577_vm0, %v576_v1  ;;  %s437_s8 = sshll.u32 %s217_s7, 2  ;;  %v438_v5 = vld [vmem:[%s727_s2] ss:$0 sm:$0xff]  ;;  %s215_s7 = scalar_lea.vmem [#allocation2], %s436_s25 }
  0x16   : > { %464 = vmatprep.mubr.msk.bf16.mxu1 %vm577_vm0, %v576_v1  ;;  %s219_s11 = scalar_lea.vmem %s725_s0, %s437_s8  ;;  %461 = vmatpush3.bf16.msra.mxu1 %v510_v3  ;;  %v441_v21 = vld [vmem:[%s729_s4] ss:$0 sm:$0xff]  ;;  %s373_s8 = sshll.u32 %s215_s7, 4  ;;  %s685_s8 = int_to_ptr.vmem [resolvable:$true] %s373_s8 }
  0x17   : > { %v221_v2 = vld [vmem:[%s219_s11] sm:$0xf]  ;;  %462 = vmatprep.subr.bf16.mxu1 %v576_v1  ;;  %s683_s11 = scalar_lea.hbm %s730_s5, %s446_s6  ;;  %s514_s22 = scalar_lea.vmem %s685_s8, 128 }
  0x18   : > { %457 = vmatmul.mubr.msk.bf16.vlgmr.msra.gmra.mxu0 %vm237_vm1, %v221_v2  ;;  %p515_p11 = scmp.ne.s32.totalorder %s685_s8, %s514_s22  ;;  %p521_p0 = scmp.lt.s32.totalorder %s685_s8, %s519_s14 }
  0x19   : > { %p522_p1 = scmp.lt.s32.totalorder %s520_s15, %s514_s22 }
  0x1a   : > { %463 = vmatpush3.bf16.msra.mxu1 %v511_v4  ;;  %p516_p12 = pnand %p515_p11, %p647_p5 }
  0x1b   : > { %p523_p2 = por %p522_p1, %p521_p0 }
  0x1c   : > { %p517_p13 = pneg %p516_p12 }
  0x1e   : > { %p524_p3 = pnand %p523_p2, %p517_p13 }
  0xd8   : > { %v275_v6 = vpop.f32.mrf.mxu0 }
  0xd9   : > { %v276_v7 = vadd.f32 %v438_v5, %v275_v6 }
  0xda   : > { %v458_v8 = vpop.f32.mrf.mxu0 }
  0xdb   : > { %v282_v9 = vmul.f32 0.044715, %v276_v7  ;;  %v281_v17 = vmul.f32 0.5, %v276_v7 }
  0xdc   : > { %v278_v10 = vpop.f32.mrf.mxu0 }
  0xdd   : > { %v283_v11 = vmul.f32 %v282_v9, %v276_v7 }
  0xde   : > { %v459_v12 = vpop.f32.mrf.mxu0 }
  0xdf   : > { %v284_v13 = vmul.f32 %v283_v11, %v276_v7 }
  0xe1   : > { %v285_v14 = vadd.f32 %v284_v13, %v276_v7 }
  0xe3   : > { %v286_v15 = vmul.f32 0.7978846, %v285_v14 }
  0xe5   : > { %512 = vtanh.f32 %v286_v15 }
  0xf2   : > { %v513_v16 = vpop.eup %512 }
  0xf3   : > { %v288_v18 = vadd.f32 1.0, %v513_v16 }
  0xf5   : > { %v289_v19 = vmul.f32 %v288_v18, %v281_v17 }
  0xf7   : > { %v290_v20 = vpack.c.bf16 %v289_v19, %v289_v19 }
  0xf9   : > { %465 = vmatmul.mubr.msk.bf16.vlgmr.msra.gmra.mxu1 %vm314_vm2, %v290_v20 }
 0x1b9   : > { %v352_v22 = vpop.f32.mrf.mxu1 }
 0x1ba   : > { %v353_v23 = vadd.f32 %v441_v21, %v352_v22 }
 0x1bb   : > { %v466_v24 = vpop.f32.mrf.mxu1 }
 0x1bc   : > { %358 = vst.msk [vmem:[%s215_s7] sm:$0xff] %vm237_vm1, %v353_v23 }
 0x1bd   : > { %v355_v25 = vpop.f32.mrf.mxu1 }
 0x1be   : > { %527 = shalt.err (!%p524_p3)
}
 0x1bf   : > { %s528_s16 = scalar_lea.hbm %s683_s11, 128  ;;  %s532_s25 = scalar_lea.hbm %s730_s5, 256 }
 0x1c0   : > { %p529_p4 = scmp.ne.s32.totalorder %s683_s11, %s528_s16  ;;  %p533_p9 = scmp.lt.s32.totalorder %s683_s11, %s730_s5 }
 0x1c1   : > { %p534_p10 = scmp.lt.s32.totalorder %s532_s25, %s528_s16 }
 0x1c2   : > { %p530_p7 = pnand %p529_p4, %p647_p5 }
 0x1c3   : > { %p535_p11 = por %p534_p10, %p533_p9 }
 0x1c4   : > { %p531_p8 = pneg %p530_p7 }
 0x1c6   : > { %p536_p12 = pnand %p535_p11, %p531_p8 }
 0x1c8   : > { %539 = shalt.err (!%p536_p12)
}
 0x1c9   : > { %468 = dma.vmem_to_hbm [thread:$0]  (%p647_p5), %s685_s8, 128, %s683_s11, %s360_s12   ;;  %v467_v26 = vpop.f32.mrf.mxu1 }
 0x1ca PF: > { %p474_p13 = scmp.ge.s32.totalorder %s574_s21, 2  ;;  %s385_s6 = sand.u32 1, %s562_s18  }
 0x1cb   : > { %s386_s7 = scalar_lea.sflag [#allocation3], %s385_s6 }
 0x1cc   : > { %p471_p0 = pnand %p474_p13, %p651_p6 }
 0x1ce   : > { %p472_p1 = pneg %p471_p0 }
 0x1d0   : > { %557 = dma.done.wait (%p472_p1), %s386_s7, 128  }
 0x1d1   : > { %559 = vsyncadd (%p472_p1), %s386_s7, 4294967168  ;;  %p15_p2 = scmp.ge.s32.totalorder %s634_s24, 4   ;;  %s733_s18 = smov %s566_s19 }
 0x1d2   : > { %s734_s19 = smov %s570_s20  ;;  %s735_s20 = smov %s645_s27 }
 0x1d3   : > { %s736_s21 = smov %s634_s24  ;;  %17 = sbr.rel (!%p15_p2) target bundleno = 3 (0x3), region = 75 }
 0x1d8   :  { %391 = vsyncpa [#allocation3], 1 }
 0x1d9   :  { %393 = vsyncpa [#allocation3 + $0x1], 1 }

</bundles_post_ra>
